<compile_context>
chip_gen: v5e
topology: v5e:2x2
jax: 0.10.0
libtpu: 0.0.40
codegen_flags: <defaults>
</compile_context>

<pallas_src>
import functools

import jax
import jax.numpy as jnp
from jax.experimental import pallas as pl
from jax.experimental.pallas import tpu as pltpu


def _round_up(x: int, m: int) -> int:
    return ((x + m - 1) // m) * m


def _row_tiling(n: int, max_tile: int = 256, align: int = 128):
    """(tile, padded) for a node-count axis.  256 keeps the MXU contraction full on
    v6e/v7x (2x256^2) and is a clean multiple of v5e's 128 lanes; small toy sizes are
    padded up to a single 128-aligned tile."""
    if n >= max_tile:
        return max_tile, _round_up(n, max_tile)
    t = _round_up(n, align)
    return t, t


def _sage_layer_kernel(adj_ref, h_ref, inv_ref, w_ref, b_ref, out_ref, acc_ref,
                       *, apply_act: bool):
    """One SAGEConv('gcn') layer: neighbor-sum SpMM over src tiles (MXU, f32 acc),
    degree normalization, fc_neigh GEMM, bias, optional leaky_relu(0.01)."""
    k = pl.program_id(1)

    @pl.when(k == 0)
    def _init():
        acc_ref[...] = jnp.zeros_like(acc_ref)

    # Adjacency arrives as int8 (halves HBM bytes); expand to bf16 in VMEM (VPU cast)
    # so the MXU runs its native bf16 path with f32 accumulation.
    adj = adj_ref[...].astype(jnp.float32).astype(jnp.bfloat16)
    acc_ref[...] += jnp.dot(adj, h_ref[...], preferred_element_type=jnp.float32)

    @pl.when(k == pl.num_programs(1) - 1)
    def _finalize():
        # Self loop is folded into the adjacency diagonal, so the aggregate is just
        # the degree-normalized row sum: (sum_neigh + h_self) / (deg + 1).
        h_neigh = acc_ref[...] * inv_ref[...]
        out = jnp.dot(h_neigh.astype(jnp.bfloat16), w_ref[...],
                      preferred_element_type=jnp.float32) + b_ref[...]
        if apply_act:
            out = jnp.where(out >= 0.0, out, 0.01 * out)   # leaky_relu, slope 0.01
        out_ref[...] = out.astype(out_ref.dtype)


def _sage_layer(adj_i8, h, inv, w_pad, b_pad, *, apply_act, out_dtype, tm, tk):
    nd_pad, ns_pad = adj_i8.shape
    fin_pad = h.shape[1]
    fout_pad = w_pad.shape[1]
    n_i = nd_pad // tm
    n_k = ns_pad // tk

    adj_kwargs = {}
    if n_k > 2:
        # Extra pipelining depth on the long adjacency DMA stream; only worth the VMEM
        # when there is an actual reduction loop to hide it behind.
        adj_kwargs["pipeline_mode"] = pl.Buffered(3)
    adj_spec = pl.BlockSpec((tm, tk), lambda i, k: (i, k), **adj_kwargs)

    grid_spec = pltpu.PrefetchScalarGridSpec(
        num_scalar_prefetch=0,
        grid=(n_i, n_k),                                            # (dst tiles, src/K tiles)
        in_specs=[
            adj_spec,                                               # adjacency tile (int8)
            pl.BlockSpec((tk, fin_pad), lambda i, k: (k, 0)),       # src features (bf16)
            pl.BlockSpec((tm, 1), lambda i, k: (i, 0)),             # 1/(deg+1) (f32)
            pl.BlockSpec((fin_pad, fout_pad), lambda i, k: (0, 0)), # fc_neigh weight (bf16)
            pl.BlockSpec((1, fout_pad), lambda i, k: (0, 0)),       # bias (f32)
        ],
        out_specs=pl.BlockSpec((tm, fout_pad), lambda i, k: (i, 0)),
        scratch_shapes=[pltpu.VMEM((tm, fin_pad), jnp.float32)],    # f32 accumulator
    )

    kernel = functools.partial(_sage_layer_kernel, apply_act=apply_act)
    return pl.pallas_call(
        kernel,
        out_shape=jax.ShapeDtypeStruct((nd_pad, fout_pad), out_dtype),
        grid_spec=grid_spec,
        compiler_params=pltpu.CompilerParams(
            dimension_semantics=("parallel", "arbitrary"),   # dst tiles split across TCs (v7x)
            vmem_limit_bytes=48 * 1024 * 1024,               # < v7x 64 MiB physical VMEM
        ),
    )(adj_i8, h, inv, w_pad, b_pad)


def graphsage_forward(adjs, x, weights, biases):
    """GraphSAGE forward (DGL SAGEConv 'gcn', eval mode): one tiled Pallas kernel per layer.

    adjs[i]: dense (num_dst_i, num_src_i) {0,1} adjacency of MFG i (no self loops
             required; dst nodes are a prefix of src nodes).
    """
    n_layer = len(weights)
    num_dst_final = adjs[-1].shape[0]
    out_feats = weights[-1].shape[1]

    h = x.astype(jnp.bfloat16)          # features stay bf16 end-to-end
    for i in range(n_layer):
        n_dst, n_src = adjs[i].shape
        fin, fout = weights[i].shape

        tm, nd_pad = _row_tiling(n_dst)
        tk, ns_pad = _row_tiling(n_src)
        fin_pad = _round_up(fin, 128)   # lane-dense feature axes
        fout_pad = _round_up(fout, 128)

        # Fold the self term into the adjacency:  (A@h + h_dst)/(deg+1) == (A+I)@h / rowsum(A+I).
        diag = jnp.arange(n_dst)
        adj_self = adjs[i].astype(jnp.float32).at[diag, diag].add(1.0)
        adj_pad = jnp.zeros((nd_pad, ns_pad), jnp.float32).at[:n_dst, :n_src].set(adj_self)
        rowsum = jnp.sum(adj_pad, axis=-1, keepdims=True)
        inv = (1.0 / jnp.maximum(rowsum, 1.0)).astype(jnp.float32)   # padded rows -> 1.0 (no NaN)
        adj_i8 = adj_pad.astype(jnp.int8)   # small-int values: exact, half the bytes of bf16

        w_pad = jnp.zeros((fin_pad, fout_pad), jnp.bfloat16).at[:fin, :fout].set(
            weights[i].astype(jnp.bfloat16))
        b_pad = jnp.zeros((1, fout_pad), jnp.float32).at[0, :fout].set(
            biases[i].astype(jnp.float32))

        # Pad features if needed (only the first layer; afterwards padded shapes chain,
        # since num_dst of layer i == num_src of layer i+1 under the same policy and
        # padded rows/lanes are annihilated by zero adjacency columns / weight rows).
        if h.shape != (ns_pad, fin_pad):
            rows = min(h.shape[0], ns_pad)
            cols = min(h.shape[1], fin_pad)
            h = jnp.zeros((ns_pad, fin_pad), jnp.bfloat16).at[:rows, :cols].set(h[:rows, :cols])

        is_last = (i == n_layer - 1)
        h = _sage_layer(adj_i8, h, inv, w_pad, b_pad,
                        apply_act=not is_last,
                        out_dtype=jnp.float32 if is_last else jnp.bfloat16,
                        tm=tm, tk=tk)

    return h[:num_dst_final, :out_feats]


if __name__ == "__main__":
    n_layer = 3
    in_feats = 16
    h_feats = 32
    # MFG node counts per layer (dst nodes are a prefix of src nodes):
    #   layer 0: 64 src -> 32 dst, layer 1: 32 src -> 16 dst, layer 2: 16 src -> 8 dst
    node_counts = [(64, 32), (32, 16), (16, 8)]

    key = jax.random.PRNGKey(0)
    keys = jax.random.split(key, 2 * n_layer + 1)

    # Input node features for the outermost MFG's src nodes.
    x = jax.random.normal(keys[0], (node_counts[0][0], in_feats), dtype=jnp.float32)

    # Deterministic dense adjacency matrices (Bernoulli(0.3)); sampled MFGs carry no
    # self-loop edges (the 'gcn' self term is handled analytically in the wrapper).
    adjs = []
    for i, (n_src, n_dst) in enumerate(node_counts):
        a = jax.random.bernoulli(keys[1 + i], p=0.3, shape=(n_dst, n_src)).astype(jnp.float32)
        diag = jnp.arange(n_dst)
        a = a.at[diag, diag].set(0.0)
        adjs.append(a)

    # SAGEConv('gcn') parameters: fc_neigh weight (in, out) and bias (out,).
    weights, biases = [], []
    for i in range(n_layer):
        fin = in_feats if i == 0 else h_feats
        w = jax.random.normal(keys[1 + n_layer + i], (fin, h_feats), dtype=jnp.float32)
        w = w * (1.0 / jnp.sqrt(jnp.float32(fin)))
        b = jnp.zeros((h_feats,), dtype=jnp.float32)
        weights.append(w)
        biases.append(b)

    out = graphsage_forward(adjs, x, weights, biases)
    jax.block_until_ready(out)
    assert out.shape == (node_counts[-1][1], h_feats)
    assert bool(jnp.all(jnp.isfinite(out)))

    # Pure-JAX f32 reference (DGL SAGEConv 'gcn' semantics) — loose tolerance because
    # the kernel carries features in bf16 (f32 MXU accumulation).
    def reference(adjs, x, weights, biases):
        h = x
        for i in range(n_layer):
            n_dst = adjs[i].shape[0]
            deg = jnp.sum(adjs[i], axis=-1, keepdims=True)
            h_neigh = (adjs[i] @ h + h[:n_dst]) / (deg + 1.0)
            h = h_neigh @ weights[i] + biases[i][None, :]
            if i != n_layer - 1:
                h = jnp.where(h >= 0.0, h, 0.01 * h)
        return h

    ref = reference(adjs, x, weights, biases)
    max_err = float(jnp.max(jnp.abs(out - ref)))
    assert max_err < 0.1, f"max abs error vs f32 reference too high: {max_err}"

    print("KERNEL_OK")
</pallas_src>

<mosaic_0001>
module attributes {stable_mosaic.version = 11 : i64} {
  func.func @_sage_layer_kernel(%arg0: i32, %arg1: i32, %arg2: memref<128x128xi8, #tpu.memory_space<vmem>>, %arg3: memref<128x128xbf16, #tpu.memory_space<vmem>>, %arg4: memref<128x1xf32, #tpu.memory_space<vmem>>, %arg5: memref<128x128xbf16, #tpu.memory_space<vmem>>, %arg6: memref<1x128xf32, #tpu.memory_space<vmem>>, %arg7: memref<128x128xbf16, #tpu.memory_space<vmem>>, %arg8: memref<128x128xf32, #tpu.memory_space<vmem>>) attributes {dimension_semantics = [#tpu.dimension_semantics<parallel>, #tpu.dimension_semantics<arbitrary>], iteration_bounds = array<i64: 1, 1>, scalar_prefetch = 0 : i64, scratch_operands = 1 : i64, tpu.core_type = #tpu.core_type<tc>, window_params = [{transform_indices = @transform_0, window_bounds = array<i64: 128, 128>}, {transform_indices = @transform_1, window_bounds = array<i64: 128, 128>}, {transform_indices = @transform_2, window_bounds = array<i64: 128, 1>}, {pipeline_mode = #tpu.pipeline_mode<synchronous>, transform_indices = @transform_3, window_bounds = array<i64: 128, 128>}, {pipeline_mode = #tpu.pipeline_mode<synchronous>, transform_indices = @transform_4, window_bounds = array<i64: 1, 128>}, {transform_indices = @transform_5, window_bounds = array<i64: 128, 128>}]} {
    %c0_i32 = arith.constant 0 : i32
    %0 = arith.cmpi eq, %arg1, %c0_i32 : i32
    %1 = arith.extui %0 : i1 to i32
    %c0_i32_0 = arith.constant 0 : i32
    %2 = arith.cmpi ne, %1, %c0_i32_0 : i32
    scf.if %2 {
      %cst_10 = arith.constant 0.000000e+00 : f32
      %14 = vector.broadcast %cst_10 : f32 to vector<128x128xf32>
      %c0_11 = arith.constant 0 : index
      %c0_12 = arith.constant 0 : index
      %15 = vector.load %arg8[%c0_11, %c0_12] : memref<128x128xf32, #tpu.memory_space<vmem>>, vector<128x128xf32>
      tpu.vector_store %arg8[%c0_11, %c0_12], %14 {strides = array<i32>} : memref<128x128xf32, #tpu.memory_space<vmem>>, vector<128x128xf32>,
    } else {
    }
    %c0 = arith.constant 0 : index
    %c0_1 = arith.constant 0 : index
    %3 = vector.load %arg2[%c0, %c0_1] : memref<128x128xi8, #tpu.memory_space<vmem>>, vector<128x128xi8>
    %4 = arith.sitofp %3 : vector<128x128xi8> to vector<128x128xf32>
    %5 = arith.truncf %4 : vector<128x128xf32> to vector<128x128xbf16>
    %c0_2 = arith.constant 0 : index
    %c0_3 = arith.constant 0 : index
    %6 = vector.load %arg8[%c0_2, %c0_3] : memref<128x128xf32, #tpu.memory_space<vmem>>, vector<128x128xf32>
    %c0_4 = arith.constant 0 : index
    %c0_5 = arith.constant 0 : index
    %7 = vector.load %arg3[%c0_4, %c0_5] : memref<128x128xbf16, #tpu.memory_space<vmem>>, vector<128x128xbf16>
    %cst = arith.constant dense<0.000000e+00> : vector<128x128xf32>
    %8 = tpu.matmul %5, %7, %cst {dimension_numbers = #tpu.dot_dimension_numbers<[1], [0], [0], [1], [0, 0, 1, 1], [], []>} : vector<128x128xbf16>, vector<128x128xbf16>, vector<128x128xf32> -> vector<128x128xf32>
    %9 = arith.addf %6, %8 : vector<128x128xf32>
    %c0_6 = arith.constant 0 : index
    %c0_7 = arith.constant 0 : index
    %10 = vector.load %arg8[%c0_6, %c0_7] : memref<128x128xf32, #tpu.memory_space<vmem>>, vector<128x128xf32>
    tpu.vector_store %arg8[%c0_6, %c0_7], %9 {strides = array<i32>} : memref<128x128xf32, #tpu.memory_space<vmem>>, vector<128x128xf32>,
    %c0_i32_8 = arith.constant 0 : i32
    %11 = arith.cmpi eq, %arg1, %c0_i32_8 : i32
    %12 = arith.extui %11 : i1 to i32
    %c0_i32_9 = arith.constant 0 : i32
    %13 = arith.cmpi ne, %12, %c0_i32_9 : i32
    scf.if %13 {
      %c0_10 = arith.constant 0 : index
      %c0_11 = arith.constant 0 : index
      %14 = vector.load %arg8[%c0_10, %c0_11] : memref<128x128xf32, #tpu.memory_space<vmem>>, vector<128x128xf32>
      %c0_12 = arith.constant 0 : index
      %c0_13 = arith.constant 0 : index
      %15 = vector.load %arg4[%c0_12, %c0_13] : memref<128x1xf32, #tpu.memory_space<vmem>>, vector<128x1xf32>
      %16 = vector.broadcast %15 : vector<128x1xf32> to vector<128x128xf32>
      %17 = arith.mulf %14, %16 : vector<128x128xf32>
      %18 = arith.truncf %17 : vector<128x128xf32> to vector<128x128xbf16>
      %c0_14 = arith.constant 0 : index
      %c0_15 = arith.constant 0 : index
      %19 = vector.load %arg5[%c0_14, %c0_15] : memref<128x128xbf16, #tpu.memory_space<vmem>>, vector<128x128xbf16>
      %cst_16 = arith.constant dense<0.000000e+00> : vector<128x128xf32>
      %20 = tpu.matmul %18, %19, %cst_16 {dimension_numbers = #tpu.dot_dimension_numbers<[1], [0], [0], [1], [0, 0, 1, 1], [], []>} : vector<128x128xbf16>, vector<128x128xbf16>, vector<128x128xf32> -> vector<128x128xf32>
      %c0_17 = arith.constant 0 : index
      %c0_18 = arith.constant 0 : index
      %21 = vector.load %arg6[%c0_17, %c0_18] : memref<1x128xf32, #tpu.memory_space<vmem>>, vector<1x128xf32>
      %22 = vector.broadcast %21 : vector<1x128xf32> to vector<128x128xf32>
      %23 = arith.addf %20, %22 : vector<128x128xf32>
      %cst_19 = arith.constant 0.000000e+00 : f32
      %24 = vector.broadcast %cst_19 : f32 to vector<128x128xf32>
      %25 = arith.cmpf oge, %23, %24 : vector<128x128xf32>
      %cst_20 = arith.constant 0.00999999977 : f32
      %26 = vector.broadcast %cst_20 : f32 to vector<128x128xf32>
      %27 = arith.mulf %26, %23 : vector<128x128xf32>
      %28 = arith.select %25, %23, %27 : vector<128x128xi1>, vector<128x128xf32>
      %29 = arith.truncf %28 : vector<128x128xf32> to vector<128x128xbf16>
      %c0_21 = arith.constant 0 : index
      %c0_22 = arith.constant 0 : index
      %30 = vector.load %arg7[%c0_21, %c0_22] : memref<128x128xbf16, #tpu.memory_space<vmem>>, vector<128x128xbf16>
      tpu.vector_store %arg7[%c0_21, %c0_22], %29 {strides = array<i32>} : memref<128x128xbf16, #tpu.memory_space<vmem>>, vector<128x128xbf16>,
    } else {
    }
    return
  }
  func.func @transform_0(%arg0: i32, %arg1: i32) -> (i32, i32) {
    %c0_i32 = arith.constant 0 : i32
    return %arg0, %arg1 : i32, i32
  }
  func.func @transform_1(%arg0: i32, %arg1: i32) -> (i32, i32) {
    %c0_i32 = arith.constant 0 : i32
    %c0_i32_0 = arith.constant 0 : i32
    return %arg1, %c0_i32 : i32, i32
  }
  func.func @transform_2(%arg0: i32, %arg1: i32) -> (i32, i32) {
    %c0_i32 = arith.constant 0 : i32
    %c0_i32_0 = arith.constant 0 : i32
    return %arg0, %c0_i32 : i32, i32
  }
  func.func @transform_3(%arg0: i32, %arg1: i32) -> (i32, i32) {
    %c0_i32 = arith.constant 0 : i32
    %c0_i32_0 = arith.constant 0 : i32
    %c0_i32_1 = arith.constant 0 : i32
    return %c0_i32, %c0_i32_0 : i32, i32
  }
  func.func @transform_4(%arg0: i32, %arg1: i32) -> (i32, i32) {
    %c0_i32 = arith.constant 0 : i32
    %c0_i32_0 = arith.constant 0 : i32
    %c0_i32_1 = arith.constant 0 : i32
    return %c0_i32, %c0_i32_0 : i32, i32
  }
  func.func @transform_5(%arg0: i32, %arg1: i32) -> (i32, i32) {
    %c0_i32 = arith.constant 0 : i32
    %c0_i32_0 = arith.constant 0 : i32
    return %arg0, %c0_i32 : i32, i32
  }
}

</mosaic_0001>

<bundles_post_ra>
// kernel: tpu_custom_call.1
= control target key start
LH: loop header
LB: loop body
LE: loop exit
PB: predicated region body
PF: predicated region fallthrough
CT: control target
= control target key end

     0   :  { %10 = vsyncpa [#allocation4], 0  ;;  %s983_s0 = inlined_call_operand.hbm [shape: s8[128,128], index: 0, kind: input, shape index: {}]   ;;  %s984_s1 = inlined_call_operand.vmem [shape: bf16[128,128], index: 1, kind: input, shape index: {}]   ;;  %s985_s2 = inlined_call_operand.vmem [shape: f32[128,1], index: 2, kind: input, shape index: {}]   ;;  %s986_s3 = inlined_call_operand.vmem [shape: bf16[128,128], index: 3, kind: input, shape index: {}]   ;;  %s987_s4 = inlined_call_operand.vmem [shape: f32[1,128], index: 4, kind: input, shape index: {}]   ;;  %s988_s5 = inlined_call_operand.hbm [shape: bf16[128,128], index: 5, kind: output, shape index: {}]  }
   0x1   :  { %11 = vsyncpa [#allocation5], 0  ;;  %s16_s20 = sshll.u32 %s983_s0, 4  ;;  %s823_s21 = smov [#allocation3]   ;;  %s17_s20 = int_to_ptr.hbm [resolvable:$true] %s16_s20 }
   0x2   :  { %s18_s22 = sshll.u32 %s823_s21, 4  ;;  %s824_s23 = smov 128   ;;  %s19_s22 = int_to_ptr.vmem [resolvable:$true] %s18_s22 }
   0x3   :  { %s825_s24 = smov 8  }
   0x4   :  { %24 = dma.hbm_to_vmem [thread:$0]  %s17_s20, 512, %s19_s22, [#allocation4], %s824_s23, %s824_s23, %s825_s24  }
   0x5   :  { %819 = dma.done.wait [#allocation4], 512  }
   0x6   :  { %820 = vsyncadd [#allocation4], 4294966784  ;;  %v826_v0 = vmov 0   ;;  %v688_v1 = vld [vmem:[%s984_s1 + $0x38] sm:$0xff]  ;;  %v289_v2 = vld [vmem:[%s985_s2 + $0x40] sm:$0xff]  ;;  %s828_s13 = smov 64  }
   0x7   :  { %767 = vset.pattern.permute.xlu0 %v826_v0  ;;  %768 = vset.pattern.permute.xlu1 %v826_v0  ;;  %v687_v3 = vld [vmem:[%s984_s1 + $0x30] sm:$0xff]  ;;  %v281_v4 = vld [vmem:[%s985_s2] sm:$0xff]  ;;  %v686_v5 = vld [vmem:[%s984_s1 + $0x28] sm:$0xff]  ;;  %s829_s14 = smov 4  }
   0x8   :  { %769 = vset.pattern.permute.xlu2 %v826_v0  ;;  %339 = vperm.xlu0 %767, %v289_v2   ;;  %v290_v6 = vld [vmem:[%s985_s2 + $0x48] sm:$0xff]  ;;  %v685_v8 = vld [vmem:[%s984_s1 + $0x20] sm:$0xff]  ;;  %v684_v9 = vld [vmem:[%s984_s1 + $0x18] sm:$0xff] }
   0x9   :  { %181 = vmatpush.bf16.msra.mxu0 %v688_v1  ;;  %744 = vmatpush.bf16.msra.mxu2 %v688_v1  ;;  %v282_v7 = vld [vmem:[%s985_s2 + $0x8] sm:$0xff]  ;;  %v283_v10 = vld [vmem:[%s985_s2 + $0x10] sm:$0xff]  ;;  %v284_v11 = vld [vmem:[%s985_s2 + $0x18] sm:$0xff] }
   0xa   :  { %299 = vperm.xlu1 %768, %v281_v4   ;;  %v291_v12 = vld [vmem:[%s985_s2 + $0x50] sm:$0xff]  ;;  %v57_v14 = vld [vmem:[#allocation3] sm:$0xff]  ;;  %v682_v20 = vld [vmem:[%s984_s1 + $0x8] sm:$0xff] }
   0xb   :  { %v683_v13 = vld [vmem:[%s984_s1 + $0x10] sm:$0xff]  ;;  %349 = vperm.xlu2 %769, %v291_v12   ;;  %v61_v16 = vunpack.c.0.s8 %v57_v14  ;;  %v62_v17 = vunpack.c.1.s8 %v57_v14  ;;  %v294_v21 = vld [vmem:[%s985_s2 + $0x68] sm:$0xff]  ;;  %v285_v22 = vld [vmem:[%s985_s2 + $0x20] sm:$0xff]  ;;  %v63_v33 = vunpack.c.2.s8 %v57_v14  ;;  %v64_v34 = vunpack.c.3.s8 %v57_v14 }
   0xc   :  { %v59_v15 = vld [vmem:[#allocation3 + $0x10] sm:$0xff]  ;;  %v681_v27 = vld [vmem:[%s984_s1] sm:$0xff]  ;;  %v296_v31 = vld [vmem:[%s985_s2 + $0x78] sm:$0xff]  ;;  %s604_s1 = sshll.u32 %s988_s5, 4  ;;  %s605_s1 = int_to_ptr.hbm [resolvable:$true] %s604_s1 }
   0xd   :  { %182 = vmatpush.bf16.msra.mxu0 %v687_v3  ;;  %745 = vmatpush.bf16.msra.mxu2 %v687_v3  ;;  %v69_v18 = vunpack.c.0.s8 %v59_v15  ;;  %v70_v19 = vunpack.c.1.s8 %v59_v15  ;;  %v77_v23 = vcvt.s32.f32 %v61_v16  ;;  %v78_v24 = vcvt.s32.f32 %v62_v17  ;;  %v295_v30 = vld [vmem:[%s985_s2 + $0x70] sm:$0xff]  ;;  %v292_v32 = vld [vmem:[%s985_s2 + $0x58] sm:$0xff]  ;;  %v293_v38 = vld [vmem:[%s985_s2 + $0x60] sm:$0xff] }
   0xe   :  { %v71_v35 = vunpack.c.2.s8 %v59_v15  ;;  %v72_v36 = vunpack.c.3.s8 %v59_v15  ;;  %v288_v37 = vld [vmem:[%s985_s2 + $0x38] sm:$0xff]  ;;  %v79_v39 = vcvt.s32.f32 %v63_v33  ;;  %v80_v40 = vcvt.s32.f32 %v64_v34  ;;  %v286_v45 = vld [vmem:[%s985_s2 + $0x28] sm:$0xff]  ;;  %v287_v52 = vld [vmem:[%s985_s2 + $0x30] sm:$0xff] }
   0xf   :  { %v85_v25 = vcvt.s32.f32 %v69_v18  ;;  %v86_v26 = vcvt.s32.f32 %v70_v19  ;;  %v93_v28 = vpack.c.bf16 %v78_v24, %v77_v23  ;;  %v58_v46 = vld [vmem:[#allocation3 + $0x8] sm:$0xff]  ;;  %v60_v47 = vld [vmem:[#allocation3 + $0x18] sm:$0xff]  ;;  %v689_v12 = vld [vmem:[%s986_s3] sm:$0xff] }
  0x10   :  { %344 = vperm.xlu0 %767, %v290_v6   ;;  %v87_v41 = vcvt.s32.f32 %v71_v35  ;;  %v88_v42 = vcvt.s32.f32 %v72_v36  ;;  %v94_v43 = vpack.c.bf16 %v80_v40, %v79_v39  ;;  %v65_v48 = vunpack.c.0.s8 %v58_v46  ;;  %v695_v6 = vld [vmem:[%s986_s3 + $0x30] sm:$0xff] }
  0x11   :  { %183 = vmatpush.bf16.msra.mxu0 %v686_v5  ;;  %746 = vmatpush.bf16.msra.mxu2 %v686_v5  ;;  %v97_v29 = vpack.c.bf16 %v86_v26, %v85_v25  ;;  %v66_v49 = vunpack.c.1.s8 %v58_v46  ;;  %v73_v50 = vunpack.c.0.s8 %v60_v47  ;;  %v74_v51 = vunpack.c.1.s8 %v60_v47  ;;  %v696_v5 = vld [vmem:[%s986_s3 + $0x38] sm:$0xff] }
  0x12   :  { %304 = vperm.xlu1 %768, %v282_v7   ;;  %v98_v44 = vpack.c.bf16 %v88_v42, %v87_v41  ;;  %v81_v53 = vcvt.s32.f32 %v65_v48  ;;  %v67_v59 = vunpack.c.2.s8 %v58_v46  ;;  %v68_v60 = vunpack.c.3.s8 %v58_v46  ;;  %469 = vmatpush.bf16.msra.mxu1 %v696_v5  ;;  %v694_v7 = vld [vmem:[%s986_s3 + $0x28] sm:$0xff] }
  0x13   :  { %354 = vperm.xlu2 %769, %v292_v32   ;;  %v82_v54 = vcvt.s32.f32 %v66_v49  ;;  %v89_v55 = vcvt.s32.f32 %v73_v50  ;;  %v90_v56 = vcvt.s32.f32 %v74_v51  ;;  %v75_v61 = vunpack.c.2.s8 %v60_v47  ;;  %752 = vmatpush.bf16.msra.mxu3 %v696_v5 }
  0x14   :  { %v76_v62 = vunpack.c.3.s8 %v60_v47  ;;  %v83_v63 = vcvt.s32.f32 %v67_v59  ;;  %v84_v0 = vcvt.s32.f32 %v68_v60 }
  0x15   :  { %184 = vmatpush.bf16.msra.mxu0 %v685_v8  ;;  %747 = vmatpush.bf16.msra.mxu2 %v685_v8  ;;  %v95_v57 = vpack.c.bf16 %v82_v54, %v81_v53  ;;  %v99_v58 = vpack.c.bf16 %v90_v56, %v89_v55  ;;  %v91_v1 = vcvt.s32.f32 %v75_v61  ;;  %v693_v8 = vld [vmem:[%s986_s3 + $0x20] sm:$0xff] }
  0x16   :  { %v92_v2 = vcvt.s32.f32 %v76_v62  ;;  %v96_v3 = vpack.c.bf16 %v84_v0, %v83_v63  ;;  %470 = vmatpush.bf16.msra.mxu1 %v695_v6 }
  0x17   :  { %753 = vmatpush.bf16.msra.mxu3 %v695_v6  ;;  %v962_v6 = vld [vmem:[%s987_s4] ss:$0 sm:$0xff]  ;;  %s827_s4 = smov [#allocation6]  }
  0x18   :  { %309 = vperm.xlu0 %767, %v283_v10   ;;  %v100_v4 = vpack.c.bf16 %v92_v2, %v91_v1  ;;  %v691_v10 = vld [vmem:[%s986_s3 + $0x10] sm:$0xff]  ;;  %s602_s10 = sshll.u32 %s827_s4, 4  ;;  %s603_s10 = int_to_ptr.vmem [resolvable:$true] %s602_s10 }
  0x19   :  { %185 = vmatpush.bf16.msra.mxu0 %v684_v9  ;;  %748 = vmatpush.bf16.msra.mxu2 %v684_v9  ;;  %v692_v9 = vld [vmem:[%s986_s3 + $0x18] sm:$0xff] }
  0x1a   :  { %314 = vperm.xlu1 %768, %v284_v11   ;;  %471 = vmatpush.bf16.msra.mxu1 %v694_v7  ;;  %v690_v11 = vld [vmem:[%s986_s3 + $0x8] sm:$0xff] }
  0x1b   :  { %359 = vperm.xlu2 %769, %v293_v38   ;;  %754 = vmatpush.bf16.msra.mxu3 %v694_v7 }
  0x1d   :  { %186 = vmatpush.bf16.msra.mxu0 %v683_v13  ;;  %749 = vmatpush.bf16.msra.mxu2 %v683_v13 }
  0x1e   :  { %472 = vmatpush.bf16.msra.mxu1 %v693_v8 }
  0x1f   :  { %755 = vmatpush.bf16.msra.mxu3 %v693_v8 }
  0x20   :  { %364 = vperm.xlu0 %767, %v294_v21  }
  0x21   :  { %187 = vmatpush.bf16.msra.mxu0 %v682_v20  ;;  %750 = vmatpush.bf16.msra.mxu2 %v682_v20 }
  0x22   :  { %319 = vperm.xlu1 %768, %v285_v22   ;;  %473 = vmatpush.bf16.msra.mxu1 %v692_v9 }
  0x23   :  { %324 = vperm.xlu2 %769, %v286_v45   ;;  %756 = vmatpush.bf16.msra.mxu3 %v692_v9 }
  0x25   :  { %188 = vmatpush.bf16.msra.mxu0 %v681_v27  ;;  %751 = vmatpush.bf16.msra.mxu2 %v681_v27 }
  0x26   :  { %474 = vmatpush.bf16.msra.mxu1 %v691_v10 }
  0x27   :  { %757 = vmatpush.bf16.msra.mxu3 %v691_v10 }
  0x28   :  { %189 = vmatmul.bf16.vlgmr.msra.gmra.mxu0 %v93_v28  ;;  %209 = vmatmul.bf16.vlgmr.msra.gmra.mxu2 %v97_v29 }
  0x29   :  { %369 = vperm.xlu0 %767, %v295_v30  }
  0x2a   :  { %374 = vperm.xlu1 %768, %v296_v31   ;;  %475 = vmatpush.bf16.msra.mxu1 %v690_v11 }
  0x2b   :  { %329 = vperm.xlu2 %769, %v287_v52   ;;  %758 = vmatpush.bf16.msra.mxu3 %v690_v11 }
  0x2e   :  { %476 = vmatpush.bf16.msra.mxu1 %v689_v12 }
  0x2f   :  { %759 = vmatpush.bf16.msra.mxu3 %v689_v12 }
  0x31   :  { %334 = vperm.xlu0 %767, %v288_v37  }
  0x38   :  { %194 = vmatmul.bf16.gmra.mxu0 %v94_v43  ;;  %214 = vmatmul.bf16.gmra.mxu2 %v98_v44 }
  0x48   :  { %199 = vmatmul.bf16.gmra.mxu0 %v95_v57  ;;  %219 = vmatmul.bf16.gmra.mxu2 %v99_v58 }
  0x58   :  { %204 = vmatmul.bf16.gmra.mxu0 %v96_v3  ;;  %224 = vmatmul.bf16.gmra.mxu2 %v100_v4 }
  0x65   :  { %v350_v20 = vpop.permute.xlu2 %349 }
  0x6d   :  { %v355_v29 = vpop.permute.xlu2 %354 }
  0x75   :  { %v360_v37 = vpop.permute.xlu2 %359 }
  0x7a   :  { %v340_v15 = vpop.permute.xlu0 %339 }
  0x7c   :  { %v300_v13 = vpop.permute.xlu1 %299 }
  0x7d   :  { %v325_v45 = vpop.permute.xlu2 %324 }
  0x82   :  { %v345_v23 = vpop.permute.xlu0 %344 }
  0x84   :  { %v305_v18 = vpop.permute.xlu1 %304 }
  0x85   :  { %v330_v58 = vpop.permute.xlu2 %329 }
  0x8a   :  { %v310_v31 = vpop.permute.xlu0 %309 }
  0x8c   :  { %v315_v32 = vpop.permute.xlu1 %314 }
  0x92   :  { %v365_v43 = vpop.permute.xlu0 %364 }
  0x94   :  { %v320_v46 = vpop.permute.xlu1 %319 }
  0x9b   :  { %v370_v51 = vpop.permute.xlu0 %369 }
  0x9c   :  { %v375_v0 = vpop.permute.xlu1 %374 }
  0xa3   :  { %v335_v59 = vpop.permute.xlu0 %334 }
  0xa5   :  { %v190_v14 = vpop.f32.mrf.mxu0 }
  0xa6   :  { %v377_v17 = vmul.f32 %v300_v13, %v190_v14 }
  0xab   :  { %v210_v16 = vpop.f32.mrf.mxu2 }
  0xac   :  { %v385_v25 = vmul.f32 %v340_v15, %v210_v16 }
  0xad   :  { %v192_v19 = vpop.f32.mrf.mxu0 }
  0xae   :  { %v378_v21 = vmul.f32 %v305_v18, %v192_v19 }
  0xb0   :  { %v393_v22 = vpack.c.bf16 %v378_v21, %v377_v17 }
  0xb2   :  { %477 = vmatmul.bf16.vlgmr.msra.gmra.mxu1 %v393_v22 }
  0xb3   :  { %v212_v24 = vpop.f32.mrf.mxu2 }
  0xb4   :  { %v386_v26 = vmul.f32 %v345_v23, %v212_v24 }
  0xb5   :  { %v195_v27 = vpop.f32.mrf.mxu0 }
  0xb6   :  { %v397_v28 = vpack.c.bf16 %v386_v26, %v385_v25  ;;  %v379_v34 = vmul.f32 %v310_v31, %v195_v27 }
  0xb8   :  { %497 = vmatmul.bf16.vlgmr.msra.gmra.mxu3 %v397_v28 }
  0xbb   :  { %v215_v30 = vpop.f32.mrf.mxu2 }
  0xbc   :  { %v387_v39 = vmul.f32 %v350_v20, %v215_v30 }
  0xbd   :  { %v197_v33 = vpop.f32.mrf.mxu0 }
  0xbe   :  { %v380_v35 = vmul.f32 %v315_v32, %v197_v33 }
  0xc0   :  { %v394_v36 = vpack.c.bf16 %v380_v35, %v379_v34 }
  0xc2   :  { %482 = vmatmul.bf16.gmra.mxu1 %v394_v36 }
  0xc3   :  { %v217_v38 = vpop.f32.mrf.mxu2 }
  0xc4   :  { %v388_v40 = vmul.f32 %v355_v29, %v217_v38 }
  0xc5   :  { %v200_v41 = vpop.f32.mrf.mxu0 }
  0xc6   :  { %v398_v42 = vpack.c.bf16 %v388_v40, %v387_v39  ;;  %v381_v48 = vmul.f32 %v320_v46, %v200_v41 }
  0xc8   :  { %502 = vmatmul.bf16.gmra.mxu3 %v398_v42 }
  0xcb   :  { %v220_v44 = vpop.f32.mrf.mxu2 }
  0xcc   :  { %v389_v53 = vmul.f32 %v360_v37, %v220_v44 }
  0xcd   :  { %v202_v47 = vpop.f32.mrf.mxu0 }
  0xce   :  { %v382_v49 = vmul.f32 %v325_v45, %v202_v47 }
  0xd0   :  { %v395_v50 = vpack.c.bf16 %v382_v49, %v381_v48 }
  0xd2   :  { %487 = vmatmul.bf16.gmra.mxu1 %v395_v50 }
  0xd3   :  { %v222_v52 = vpop.f32.mrf.mxu2 }
  0xd4   :  { %v390_v54 = vmul.f32 %v365_v43, %v222_v52 }
  0xd5   :  { %v205_v55 = vpop.f32.mrf.mxu0 }
  0xd6   :  { %v399_v56 = vpack.c.bf16 %v390_v54, %v389_v53  ;;  %v383_v61 = vmul.f32 %v330_v58, %v205_v55 }
  0xd8   :  { %507 = vmatmul.bf16.gmra.mxu3 %v399_v56 }
  0xdb   :  { %v225_v57 = vpop.f32.mrf.mxu2 }
  0xdc   :  { %v391_v2 = vmul.f32 %v370_v51, %v225_v57 }
  0xdd   :  { %v207_v60 = vpop.f32.mrf.mxu0 }
  0xde   :  { %v384_v62 = vmul.f32 %v335_v59, %v207_v60 }
  0xe0   :  { %v396_v63 = vpack.c.bf16 %v384_v62, %v383_v61 }
  0xe2   :  { %492 = vmatmul.bf16.gmra.mxu1 %v396_v63 }
  0xe3   :  { %v227_v1 = vpop.f32.mrf.mxu2 }
  0xe4   :  { %v392_v3 = vmul.f32 %v375_v0, %v227_v1 }
  0xe6   :  { %v400_v4 = vpack.c.bf16 %v392_v3, %v391_v2 }
  0xe8   :  { %512 = vmatmul.bf16.gmra.mxu3 %v400_v4 }
 0x12f   :  { %v478_v5 = vpop.f32.mrf.mxu1 }
 0x130   :  { %v479_v7 = vadd.f32 %v962_v6, %v478_v5 }
 0x132   :  { %v534_v9 = vmul.f32 0.01, %v479_v7  ;;  %vm518_vm0 = vcmp.ge.f32.partialorder %v479_v7, 0.0 }
 0x134   :  { %v550_v13 = vsel %vm518_vm0, %v479_v7, %v534_v9 }
 0x137   :  { %v480_v8 = vpop.f32.mrf.mxu1 }
 0x138   :  { %v481_v10 = vadd.f32 %v962_v6, %v480_v8 }
 0x13a   :  { %vm519_vm1 = vcmp.ge.f32.partialorder %v481_v10, 0.0  ;;  %v535_v11 = vmul.f32 0.01, %v481_v10 }
 0x13b   :  { %v498_v12 = vpop.f32.mrf.mxu3 }
 0x13c   :  { %v551_v14 = vsel %vm519_vm1, %v481_v10, %v535_v11  ;;  %v499_v17 = vadd.f32 %v962_v6, %v498_v12 }
 0x13d   :  { %v700_v15 = vpack.c.bf16 %v551_v14, %v550_v13 }
 0x13e   :  { %v542_v19 = vmul.f32 0.01, %v499_v17  ;;  %vm526_vm2 = vcmp.ge.f32.partialorder %v499_v17, 0.0 }
 0x13f   :  { %701 = vst [vmem:[#allocation6] sm:$0xff] %v700_v15   ;;  %v483_v16 = vpop.f32.mrf.mxu1 }
 0x140   :  { %v484_v20 = vadd.f32 %v962_v6, %v483_v16  ;;  %v558_v24 = vsel %vm526_vm2, %v499_v17, %v542_v19 }
 0x142   :  { %v536_v25 = vmul.f32 0.01, %v484_v20  ;;  %vm520_vm4 = vcmp.ge.f32.partialorder %v484_v20, 0.0 }
 0x143   :  { %v500_v18 = vpop.f32.mrf.mxu3 }
 0x144   :  { %v501_v21 = vadd.f32 %v962_v6, %v500_v18  ;;  %v552_v31 = vsel %vm520_vm4, %v484_v20, %v536_v25 }
 0x146   :  { %vm527_vm3 = vcmp.ge.f32.partialorder %v501_v21, 0.0  ;;  %v543_v22 = vmul.f32 0.01, %v501_v21 }
 0x147   :  { %v485_v23 = vpop.f32.mrf.mxu1 }
 0x148   :  { %v559_v26 = vsel %vm527_vm3, %v501_v21, %v543_v22  ;;  %v486_v27 = vadd.f32 %v962_v6, %v485_v23 }
 0x149   :  { %v720_v28 = vpack.c.bf16 %v559_v26, %v558_v24 }
 0x14a   :  { %vm521_vm5 = vcmp.ge.f32.partialorder %v486_v27, 0.0  ;;  %v537_v29 = vmul.f32 0.01, %v486_v27 }
 0x14b   :  { %740 = vst [vmem:[#allocation6 + $0x20] sm:$0xff] %v720_v28   ;;  %v503_v30 = vpop.f32.mrf.mxu3 }
 0x14c   :  { %v553_v32 = vsel %vm521_vm5, %v486_v27, %v537_v29  ;;  %v504_v35 = vadd.f32 %v962_v6, %v503_v30 }
 0x14d   :  { %v705_v33 = vpack.c.bf16 %v553_v32, %v552_v31 }
 0x14e   :  { %v544_v37 = vmul.f32 0.01, %v504_v35  ;;  %vm528_vm6 = vcmp.ge.f32.partialorder %v504_v35, 0.0 }
 0x14f   :  { %737 = vst [vmem:[#allocation6 + $0x8] sm:$0xff] %v705_v33   ;;  %v488_v34 = vpop.f32.mrf.mxu1 }
 0x150   :  { %v489_v38 = vadd.f32 %v962_v6, %v488_v34  ;;  %v560_v42 = vsel %vm528_vm6, %v504_v35, %v544_v37 }
 0x152   :  { %v538_v43 = vmul.f32 0.01, %v489_v38  ;;  %vm522_vm8 = vcmp.ge.f32.partialorder %v489_v38, 0.0 }
 0x153   :  { %v505_v36 = vpop.f32.mrf.mxu3 }
 0x154   :  { %v506_v39 = vadd.f32 %v962_v6, %v505_v36  ;;  %v554_v49 = vsel %vm522_vm8, %v489_v38, %v538_v43 }
 0x156   :  { %vm529_vm7 = vcmp.ge.f32.partialorder %v506_v39, 0.0  ;;  %v545_v40 = vmul.f32 0.01, %v506_v39 }
 0x157   :  { %v490_v41 = vpop.f32.mrf.mxu1 }
 0x158   :  { %v561_v44 = vsel %vm529_vm7, %v506_v39, %v545_v40  ;;  %v491_v45 = vadd.f32 %v962_v6, %v490_v41 }
 0x159   :  { %v725_v46 = vpack.c.bf16 %v561_v44, %v560_v42 }
 0x15a   :  { %vm523_vm9 = vcmp.ge.f32.partialorder %v491_v45, 0.0  ;;  %v539_v47 = vmul.f32 0.01, %v491_v45 }
 0x15b   :  { %741 = vst [vmem:[#allocation6 + $0x28] sm:$0xff] %v725_v46   ;;  %v508_v48 = vpop.f32.mrf.mxu3 }
 0x15c   :  { %v555_v50 = vsel %vm523_vm9, %v491_v45, %v539_v47  ;;  %v509_v53 = vadd.f32 %v962_v6, %v508_v48 }
 0x15d   :  { %v710_v51 = vpack.c.bf16 %v555_v50, %v554_v49 }
 0x15e   :  { %v546_v55 = vmul.f32 0.01, %v509_v53  ;;  %vm530_vm10 = vcmp.ge.f32.partialorder %v509_v53, 0.0 }
 0x15f   :  { %738 = vst [vmem:[#allocation6 + $0x10] sm:$0xff] %v710_v51   ;;  %v493_v52 = vpop.f32.mrf.mxu1 }
 0x160   :  { %v494_v56 = vadd.f32 %v962_v6, %v493_v52  ;;  %v562_v60 = vsel %vm530_vm10, %v509_v53, %v546_v55 }
 0x162   :  { %v540_v61 = vmul.f32 0.01, %v494_v56  ;;  %vm524_vm12 = vcmp.ge.f32.partialorder %v494_v56, 0.0 }
 0x163   :  { %v510_v54 = vpop.f32.mrf.mxu3 }
 0x164   :  { %v511_v57 = vadd.f32 %v962_v6, %v510_v54  ;;  %v556_v3 = vsel %vm524_vm12, %v494_v56, %v540_v61 }
 0x166   :  { %vm531_vm11 = vcmp.ge.f32.partialorder %v511_v57, 0.0  ;;  %v547_v58 = vmul.f32 0.01, %v511_v57 }
 0x167   :  { %v495_v59 = vpop.f32.mrf.mxu1 }
 0x168   :  { %v563_v62 = vsel %vm531_vm11, %v511_v57, %v547_v58  ;;  %v496_v63 = vadd.f32 %v962_v6, %v495_v59 }
 0x169   :  { %v730_v0 = vpack.c.bf16 %v563_v62, %v562_v60 }
 0x16a   :  { %vm525_vm13 = vcmp.ge.f32.partialorder %v496_v63, 0.0  ;;  %v541_v1 = vmul.f32 0.01, %v496_v63 }
 0x16b   :  { %742 = vst [vmem:[#allocation6 + $0x30] sm:$0xff] %v730_v0   ;;  %v513_v2 = vpop.f32.mrf.mxu3 }
 0x16c   :  { %v557_v4 = vsel %vm525_vm13, %v496_v63, %v541_v1  ;;  %v514_v7 = vadd.f32 %v962_v6, %v513_v2 }
 0x16d   :  { %v715_v5 = vpack.c.bf16 %v557_v4, %v556_v3 }
 0x16e   :  { %v548_v9 = vmul.f32 0.01, %v514_v7  ;;  %vm532_vm14 = vcmp.ge.f32.partialorder %v514_v7, 0.0 }
 0x16f   :  { %739 = vst [vmem:[#allocation6 + $0x18] sm:$0xff] %v715_v5  }
 0x170   :  { %v564_v12 = vsel %vm532_vm14, %v514_v7, %v548_v9 }
 0x173   :  { %v515_v8 = vpop.f32.mrf.mxu3 }
 0x174   :  { %v516_v10 = vadd.f32 %v962_v6, %v515_v8 }
 0x176   :  { %vm533_vm15 = vcmp.ge.f32.partialorder %v516_v10, 0.0  ;;  %v549_v11 = vmul.f32 0.01, %v516_v10 }
 0x178   :  { %v565_v13 = vsel %vm533_vm15, %v516_v10, %v549_v11 }
 0x179   :  { %v735_v14 = vpack.c.bf16 %v565_v13, %v564_v12 }
 0x17b   :  { %743 = vst [vmem:[#allocation6 + $0x38] sm:$0xff] %v735_v14  }
 0x17c   :  { %610 = dma.vmem_to_hbm [thread:$0]  %s603_s10, 1024, %s605_s1, [#allocation5], %s828_s13, %s828_s13, %s829_s14  }
 0x17d   :  { %821 = dma.done.wait [#allocation5], 1024  }
 0x17e   :  { %822 = vsyncadd [#allocation5], 4294966272 }
 0x17f   :  { %615 = vsyncpa [#allocation4], 1 }
 0x180   :  { %616 = vsyncpa [#allocation5], 1 }

</bundles_post_ra>
